<compile_context>
chip_gen: v7x
topology: tpu7x:2x2x1
jax: 0.10.0
libtpu: 0.0.40
codegen_flags: <defaults>
</compile_context>

<pallas_src>
from functools import partial

import numpy as np
import jax
import jax.numpy as jnp
from jax import lax
from jax.experimental import pallas as pl
from jax.experimental.pallas import tpu as pltpu

EPS = float(jnp.finfo(jnp.float32).eps)   # == torch.finfo(torch.float32).eps

# ----------------------------- config (synthetic FCOS) ----------------------
IMG_H, IMG_W = 32, 32
IN_CH = 3
FEAT_CH = 8
NUM_CLASSES = 4
STRIDES = (4, 8, 16)
NUM_LEVELS = len(STRIDES)
NUM_CAM_LEVELS = NUM_LEVELS - 1     # reference uses x[:-1]
NUM_SCORES = 5                      # class score + 4 box distances
NUM_SCORES_PAD = 8                  # padded to full sublanes (M=8 for MXU/VPU)
N_PAD = 128                         # padded number of candidate boxes (lane width)
N_LANES = 128                       # packed lane width for CAM kernel (K of the matmul)

# per-CAM-level flattened spatial sizes and lane offsets (lanes 0:64 lvl0, 64:80 lvl1)
HW_LVL = tuple((IMG_H // STRIDES[l]) * (IMG_W // STRIDES[l]) for l in range(NUM_CAM_LEVELS))
HW0 = HW_LVL[0]
HW_TOT = sum(HW_LVL)
assert HW_TOT <= N_LANES


# ---------------- precomputed bilinear-resize operators (host, numpy) --------
def _bilinear_matrix(src_size, dst_size):
    # half-pixel bilinear with edge clamp == cv2.resize INTER_LINEAR convention
    i = np.arange(dst_size, dtype=np.float64)
    s = (i + 0.5) * (src_size / dst_size) - 0.5
    i0 = np.floor(s).astype(np.int64)
    frac = s - i0
    i1 = i0 + 1
    i0c = np.clip(i0, 0, src_size - 1)
    i1c = np.clip(i1, 0, src_size - 1)
    M = np.zeros((dst_size, src_size), dtype=np.float64)
    rows = np.arange(dst_size)
    np.add.at(M, (rows, i0c), 1.0 - frac)
    np.add.at(M, (rows, i1c), frac)
    return M


def _resize_operator(h, w):
    # (h*w, IMG_H*IMG_W): resized_flat = cam_flat @ M   (row-major flattening)
    Rh = _bilinear_matrix(h, IMG_H)     # (IMG_H, h)
    Rw = _bilinear_matrix(w, IMG_W)     # (IMG_W, w)
    return np.ascontiguousarray(np.kron(Rh, Rw).T.astype(np.float32))


def _packed_resize_operator():
    # (N_LANES, IMG_H*IMG_W): rows 0:64 = level0 op, 64:80 = level1 op, rest 0.
    # The 1/NUM_CAM_LEVELS mean-over-levels factor is folded in.
    op = np.zeros((N_LANES, IMG_H * IMG_W), dtype=np.float32)
    off = 0
    for lvl in range(NUM_CAM_LEVELS):
        h, w = IMG_H // STRIDES[lvl], IMG_W // STRIDES[lvl]
        op[off:off + h * w, :] = _resize_operator(h, w) * (1.0 / NUM_CAM_LEVELS)
        off += h * w
    return op


_PACKED_RESIZE_OP_F32 = _packed_resize_operator()       # bf16 cast done at trace time


# ======================= Pallas kernel 1: decode/IoU/argmax ==================
# packed_ref rows: 0-1 priors(x,y), 2-5 bbox_pred(l,t,r,b), 6 score[target_class], 7 pad
def _decode_iou_argmax_kernel(scal_ref, nvalid_ref, packed_ref, idx_ref):
    npad = packed_ref.shape[1]
    data = packed_ref[...]
    px = data[0:1, :]
    py = data[1:2, :]
    l = data[2:3, :]
    t = data[3:4, :]
    r = data[4:5, :]
    b = data[5:6, :]
    sc = data[6:7, :]
    img_h = scal_ref[6]
    img_w = scal_ref[7]
    # FCOS distance2bbox decode, clipped to img_shape (max_shape)
    x1 = jnp.clip(px - l, 0.0, img_w)
    y1 = jnp.clip(py - t, 0.0, img_h)
    x2 = jnp.clip(px + r, 0.0, img_w)
    y2 = jnp.clip(py + b, 0.0, img_h)
    # scale_boxes(bboxes, 1/scale_factor)
    inv_sx = scal_ref[4]
    inv_sy = scal_ref[5]
    x1 = x1 * inv_sx
    x2 = x2 * inv_sx
    y1 = y1 * inv_sy
    y2 = y2 * inv_sy
    # calculate_iou(bboxes, target_box)
    tx1 = scal_ref[0]; ty1 = scal_ref[1]; tx2 = scal_ref[2]; ty2 = scal_ref[3]
    ix1 = jnp.maximum(x1, tx1)
    iy1 = jnp.maximum(y1, ty1)
    ix2 = jnp.minimum(x2, tx2)
    iy2 = jnp.minimum(y2, ty2)
    inter = jnp.maximum(ix2 - ix1, 0.0) * jnp.maximum(iy2 - iy1, 0.0)
    area = (x2 - x1) * (y2 - y1)
    tarea = (tx2 - tx1) * (ty2 - ty1)
    union = jnp.maximum(area + tarea - inter, EPS)   # eps-clamp: avoid NaN -> OOB idx
    iou = inter / union
    # (ious * scores[:, target_class]).argmax()
    combined = iou * sc
    lanes = lax.broadcasted_iota(jnp.int32, (1, npad), 1)
    valid = lanes < nvalid_ref[0]
    combined = jnp.where(valid, combined, -jnp.inf)
    m = jnp.max(combined)
    # first-occurrence argmax; if every lane were masked (n_valid==0, impossible
    # here since n is a static positive constant), lane 0 wins and is clamped later.
    idx = jnp.min(jnp.where(combined >= m, lanes, npad))
    idx_ref[0] = idx.astype(jnp.int32)


def decode_iou_argmax(packed, scal_f32, n_valid):
    return pl.pallas_call(
        _decode_iou_argmax_kernel,
        out_shape=jax.ShapeDtypeStruct((1,), jnp.int32),
        in_specs=[
            pl.BlockSpec(memory_space=pltpu.MemorySpace.SMEM),   # scalars (f32, 8)
            pl.BlockSpec(memory_space=pltpu.MemorySpace.SMEM),   # n_valid (i32, 1)
            pl.BlockSpec(memory_space=pltpu.MemorySpace.VMEM),   # packed (8, N_PAD)
        ],
        out_specs=pl.BlockSpec(memory_space=pltpu.MemorySpace.SMEM),
    )(scal_f32, n_valid, packed)


# ======= Pallas kernel 2: fused CAM + normalize + resize + mean + max ========
# Inputs (both CAM levels packed along lanes):
#   f_ref : (FEAT_CH, 128)            f32   lanes 0:64 = lvl0, 64:80 = lvl1, rest 0
#   g_ref : (NUM_SCORES_PAD*FEAT_CH, 128) f32  rows s*C..s*C+C-1 = grads of score s
#   op_ref: (128, IMG_H*IMG_W)        bf16  row-stacked resize ops (mean folded in)
# Output: (1, IMG_H*IMG_W) lane-dense saliency map (max over the 5 scores).
def _cam_resize_combine_kernel(f_ref, g_ref, op_ref, out_ref):
    f = f_ref[...]                                               # (C, 128)
    g = g_ref[...].reshape(NUM_SCORES_PAD, FEAT_CH, N_LANES)     # (8, C, 128)
    # cam[s, lane] = relu(sum_c grad[s,c,lane] * feat[c,lane])   (all scores at once)
    cam = jnp.maximum(jnp.sum(g * f[None, :, :], axis=1), 0.0)   # (8, 128)

    lanes = lax.broadcasted_iota(jnp.int32, (NUM_SCORES_PAD, N_LANES), 1)
    m0 = lanes < HW0
    m1 = jnp.logical_and(lanes >= HW0, lanes < HW_TOT)

    def _norm(mask):
        mn = jnp.min(jnp.where(mask, cam, jnp.inf), axis=1, keepdims=True)
        mx = jnp.max(jnp.where(mask, cam, -jnp.inf), axis=1, keepdims=True)
        return (cam - mn) / jnp.maximum(mx - mn, EPS)            # clamp(min=eps)

    # per-(score, level) min-max normalization, padded lanes -> 0
    cam_n = jnp.where(m0, _norm(m0), jnp.where(m1, _norm(m1), 0.0))

    # bilinear resize of both levels + mean over levels: ONE MXU matmul.
    # bf16 only at the MXU boundary; accumulation stays f32.
    acc = jnp.dot(cam_n.astype(jnp.bfloat16), op_ref[...],
                  preferred_element_type=jnp.float32)            # (8, 1024)

    # per-score normalization of the mean map (padded score rows normalize to 0
    # and cannot win the max since real normalized values are >= 0)
    mn = jnp.min(acc, axis=1, keepdims=True)
    mx = jnp.max(acc, axis=1, keepdims=True)
    nrm = (acc - mn) / jnp.maximum(mx - mn, EPS)
    out_ref[...] = jnp.max(nrm, axis=0, keepdims=True)           # np.max(tmp, axis=0)


def cam_resize_combine(feats_packed, grads_packed, op_bf16):
    out = pl.pallas_call(
        _cam_resize_combine_kernel,
        out_shape=jax.ShapeDtypeStruct((1, IMG_H * IMG_W), jnp.float32),
        in_specs=[pl.BlockSpec(memory_space=pltpu.MemorySpace.VMEM)] * 3,
        out_specs=pl.BlockSpec(memory_space=pltpu.MemorySpace.VMEM),
    )(feats_packed, grads_packed, op_bf16)
    return out.reshape(IMG_H, IMG_W)


# ==================== synthetic FCOS detection model (glue) ==================
def init_params(key):
    ks = jax.random.split(key, 6)
    return {
        "backbone_w": [0.2 * jax.random.normal(jax.random.fold_in(ks[0], i),
                                               (IN_CH, FEAT_CH), jnp.float32)
                       for i in range(NUM_LEVELS)],
        "backbone_b": [0.01 * (i + 1) * jnp.ones((FEAT_CH,), jnp.float32)
                       for i in range(NUM_LEVELS)],
        "w_cls": 0.2 * jax.random.normal(ks[1], (FEAT_CH, NUM_CLASSES), jnp.float32),
        "b_cls": jnp.zeros((NUM_CLASSES,), jnp.float32),
        "w_box": 0.2 * jax.random.normal(ks[2], (FEAT_CH, 4), jnp.float32),
        "b_box": jnp.zeros((4,), jnp.float32),
        "w_ctr": 0.2 * jax.random.normal(ks[3], (FEAT_CH, 1), jnp.float32),
        "b_ctr": jnp.zeros((1,), jnp.float32),
    }


def extract_feat(image, params):
    # image: (H, W, 3) float32 -> list of per-level features (C, h, w)
    # TODO(synk): stands in for the mmdet backbone+FPN (not translatable here).
    feats = []
    for lvl, s in enumerate(STRIDES):
        h, w = IMG_H // s, IMG_W // s
        pooled = image.reshape(h, s, w, s, IN_CH).mean(axis=(1, 3))      # (h, w, 3)
        f = jnp.tanh(pooled @ params["backbone_w"][lvl] + params["backbone_b"][lvl])
        feats.append(jnp.transpose(f, (2, 0, 1)))                         # (C, h, w)
    return feats


def head_forward(features, params):
    # shared 1x1-conv FCOS-style head; flattening matches
    # torch: x.permute(1, 2, 0).reshape(-1, C)   (row-major over h, w)
    mlvl_scores, mlvl_bbox = [], []
    for lvl, f in enumerate(features):
        c, h, w = f.shape
        flat = f.reshape(c, h * w).T                                       # (hw, C)
        cls = flat @ params["w_cls"] + params["b_cls"]
        box_raw = flat @ params["w_box"] + params["b_box"]
        ctr = flat @ params["w_ctr"] + params["b_ctr"]
        _ = jax.nn.sigmoid(ctr)             # score_factor: computed, unused (as in reference)
        bbox_pred = jax.nn.softplus(box_raw) * STRIDES[lvl]               # positive l,t,r,b
        scores = jax.nn.sigmoid(cls)
        mlvl_scores.append(scores)
        mlvl_bbox.append(bbox_pred)
    return jnp.concatenate(mlvl_scores, 0), jnp.concatenate(mlvl_bbox, 0)


def grid_priors():
    pts = []
    for s in STRIDES:
        h, w = IMG_H // s, IMG_W // s
        xs = (jnp.arange(w, dtype=jnp.float32) + 0.5) * s
        ys = (jnp.arange(h, dtype=jnp.float32) + 0.5) * s
        yy, xx = jnp.meshgrid(ys, xs, indexing="ij")
        pts.append(jnp.stack([xx.reshape(-1), yy.reshape(-1)], axis=-1))  # (hw, 2)
    return jnp.concatenate(pts, 0)


# ============================== ODAM forward ================================
@partial(jax.jit, static_argnums=(1,))
def fcos_odam_forward(image, target_class, target_box, params,
                      scale_factor=(1.0, 1.0)):
    features = extract_feat(image, params)          # grads taken w.r.t. these (retain_grad)
    scores, bbox_pred = head_forward(features, params)
    priors = grid_priors()
    n = priors.shape[0]

    # ---- Pallas kernel 1: decode + scale + IoU + (iou*score) argmax --------
    # pack priors / bbox / target-class scores into a single (8, N_PAD) tile
    packed = jnp.concatenate(
        [priors.T,                                                    # (2, n)
         bbox_pred.T,                                                 # (4, n)
         scores[:, target_class:target_class + 1].T,                  # (1, n)
         jnp.zeros((1, n), jnp.float32)], axis=0)                     # (8, n)
    packed = jnp.pad(packed, ((0, 0), (0, N_PAD - n)))
    # NOTE: target_box is expressed in the same post-rescale (original-image)
    # frame as the scaled/decoded boxes, matching the reference.
    scal = jnp.array([target_box[0], target_box[1], target_box[2], target_box[3],
                      1.0 / scale_factor[0], 1.0 / scale_factor[1],
                      float(IMG_H), float(IMG_W)], dtype=jnp.float32)
    nvalid = jnp.array([n], dtype=jnp.int32)
    idx = decode_iou_argmax(packed, scal, nvalid)[0]
    idx = jnp.minimum(idx, n - 1)                    # safety clamp

    # ---- gradients of the 5 target scalars w.r.t. the feature maps ---------
    # (torch: score.backward(); x[l].grad)  -> plain-JAX autodiff.
    def scalar_targets(feats):
        sc, bp = head_forward(feats, params)
        return jnp.stack([sc[idx, target_class],
                          bp[idx, 0], bp[idx, 1], bp[idx, 2], bp[idx, 3]])

    grads = jax.jacrev(scalar_targets)(features)     # list per level: (5, C, h, w)

    # ---- Pallas kernel 2: fused CAM + normalize + resize + mean + max -------
    # Pack both CAM levels (x[:-1]) along the lane axis so the whole fused
    # kernel uses one (8,128) feat tile, one (64,128) grad tile and one MXU op.
    feat_cat = jnp.concatenate(
        [features[lvl].reshape(FEAT_CH, HW_LVL[lvl]) for lvl in range(NUM_CAM_LEVELS)],
        axis=1)                                                        # (C, 80)
    feats_packed = jnp.pad(feat_cat, ((0, 0), (0, N_LANES - HW_TOT)))  # (C, 128)

    grad_cat = jnp.concatenate(
        [grads[lvl].reshape(NUM_SCORES * FEAT_CH, HW_LVL[lvl])
         for lvl in range(NUM_CAM_LEVELS)], axis=1)                    # (40, 80)
    grads_packed = jnp.pad(
        grad_cat,
        ((0, (NUM_SCORES_PAD - NUM_SCORES) * FEAT_CH), (0, N_LANES - HW_TOT)))  # (64, 128)

    op_bf16 = jnp.asarray(_PACKED_RESIZE_OP_F32, dtype=jnp.bfloat16)   # (128, 1024)

    return cam_resize_combine(feats_packed, grads_packed, op_bf16)     # (H, W)


# ==================================== main ==================================
if __name__ == "__main__":
    key = jax.random.PRNGKey(0)
    k_img, k_param = jax.random.split(key)
    image = jax.random.uniform(k_img, (IMG_H, IMG_W, IN_CH), jnp.float32)
    params = init_params(k_param)
    target_class = 1
    target_box = jnp.array([6.0, 6.0, 24.0, 22.0], jnp.float32)

    saliency = fcos_odam_forward(image, target_class, target_box, params)
    saliency = jax.block_until_ready(saliency)
    assert saliency.shape == (IMG_H, IMG_W)
    assert bool(jnp.all(jnp.isfinite(saliency)))
    print("KERNEL_OK")
</pallas_src>

<mosaic_0001>
module attributes {stable_mosaic.version = 11 : i64} {
  func.func @_decode_iou_argmax_kernel(%arg0: memref<8xf32, #tpu.memory_space<smem>>, %arg1: memref<1xi32, #tpu.memory_space<smem>>, %arg2: memref<8x128xf32, #tpu.memory_space<vmem>>, %arg3: memref<1xi32, #tpu.memory_space<smem>>) attributes {dimension_semantics = [], scalar_prefetch = 0 : i64, scratch_operands = 0 : i64, tpu.core_type = #tpu.core_type<tc>} {
    %c0 = arith.constant 0 : index
    %c0_0 = arith.constant 0 : index
    %0 = vector.load %arg2[%c0, %c0_0] : memref<8x128xf32, #tpu.memory_space<vmem>>, vector<8x128xf32>
    %1 = vector.extract_strided_slice %0 {offsets = [0, 0], sizes = [1, 128], strides = [1, 1]} : vector<8x128xf32> to vector<1x128xf32>
    %2 = vector.extract_strided_slice %0 {offsets = [1, 0], sizes = [1, 128], strides = [1, 1]} : vector<8x128xf32> to vector<1x128xf32>
    %3 = vector.extract_strided_slice %0 {offsets = [2, 0], sizes = [1, 128], strides = [1, 1]} : vector<8x128xf32> to vector<1x128xf32>
    %4 = vector.extract_strided_slice %0 {offsets = [3, 0], sizes = [1, 128], strides = [1, 1]} : vector<8x128xf32> to vector<1x128xf32>
    %5 = vector.extract_strided_slice %0 {offsets = [4, 0], sizes = [1, 128], strides = [1, 1]} : vector<8x128xf32> to vector<1x128xf32>
    %6 = vector.extract_strided_slice %0 {offsets = [5, 0], sizes = [1, 128], strides = [1, 1]} : vector<8x128xf32> to vector<1x128xf32>
    %7 = vector.extract_strided_slice %0 {offsets = [6, 0], sizes = [1, 128], strides = [1, 1]} : vector<8x128xf32> to vector<1x128xf32>
    %c6 = arith.constant 6 : index
    %8 = memref.load %arg0[%c6] : memref<8xf32, #tpu.memory_space<smem>>
    %c7 = arith.constant 7 : index
    %9 = memref.load %arg0[%c7] : memref<8xf32, #tpu.memory_space<smem>>
    %10 = arith.subf %1, %3 : vector<1x128xf32>
    %cst = arith.constant 0.000000e+00 : f32
    %11 = vector.broadcast %cst : f32 to vector<1x128xf32>
    %12 = arith.maximumf %11, %10 : vector<1x128xf32>
    %13 = vector.broadcast %9 : f32 to vector<1x128xf32>
    %14 = arith.minimumf %13, %12 : vector<1x128xf32>
    %15 = arith.subf %2, %4 : vector<1x128xf32>
    %cst_1 = arith.constant 0.000000e+00 : f32
    %16 = vector.broadcast %cst_1 : f32 to vector<1x128xf32>
    %17 = arith.maximumf %16, %15 : vector<1x128xf32>
    %18 = vector.broadcast %8 : f32 to vector<1x128xf32>
    %19 = arith.minimumf %18, %17 : vector<1x128xf32>
    %20 = arith.addf %1, %5 : vector<1x128xf32>
    %cst_2 = arith.constant 0.000000e+00 : f32
    %21 = vector.broadcast %cst_2 : f32 to vector<1x128xf32>
    %22 = arith.maximumf %21, %20 : vector<1x128xf32>
    %23 = vector.broadcast %9 : f32 to vector<1x128xf32>
    %24 = arith.minimumf %23, %22 : vector<1x128xf32>
    %25 = arith.addf %2, %6 : vector<1x128xf32>
    %cst_3 = arith.constant 0.000000e+00 : f32
    %26 = vector.broadcast %cst_3 : f32 to vector<1x128xf32>
    %27 = arith.maximumf %26, %25 : vector<1x128xf32>
    %28 = vector.broadcast %8 : f32 to vector<1x128xf32>
    %29 = arith.minimumf %28, %27 : vector<1x128xf32>
    %c4 = arith.constant 4 : index
    %30 = memref.load %arg0[%c4] : memref<8xf32, #tpu.memory_space<smem>>
    %c5 = arith.constant 5 : index
    %31 = memref.load %arg0[%c5] : memref<8xf32, #tpu.memory_space<smem>>
    %32 = vector.broadcast %30 : f32 to vector<1x128xf32>
    %33 = arith.mulf %14, %32 : vector<1x128xf32>
    %34 = vector.broadcast %30 : f32 to vector<1x128xf32>
    %35 = arith.mulf %24, %34 : vector<1x128xf32>
    %36 = vector.broadcast %31 : f32 to vector<1x128xf32>
    %37 = arith.mulf %19, %36 : vector<1x128xf32>
    %38 = vector.broadcast %31 : f32 to vector<1x128xf32>
    %39 = arith.mulf %29, %38 : vector<1x128xf32>
    %c0_4 = arith.constant 0 : index
    %40 = memref.load %arg0[%c0_4] : memref<8xf32, #tpu.memory_space<smem>>
    %c1 = arith.constant 1 : index
    %41 = memref.load %arg0[%c1] : memref<8xf32, #tpu.memory_space<smem>>
    %c2 = arith.constant 2 : index
    %42 = memref.load %arg0[%c2] : memref<8xf32, #tpu.memory_space<smem>>
    %c3 = arith.constant 3 : index
    %43 = memref.load %arg0[%c3] : memref<8xf32, #tpu.memory_space<smem>>
    %44 = vector.broadcast %40 : f32 to vector<1x128xf32>
    %45 = arith.maximumf %33, %44 : vector<1x128xf32>
    %46 = vector.broadcast %41 : f32 to vector<1x128xf32>
    %47 = arith.maximumf %37, %46 : vector<1x128xf32>
    %48 = vector.broadcast %42 : f32 to vector<1x128xf32>
    %49 = arith.minimumf %35, %48 : vector<1x128xf32>
    %50 = vector.broadcast %43 : f32 to vector<1x128xf32>
    %51 = arith.minimumf %39, %50 : vector<1x128xf32>
    %52 = arith.subf %49, %45 : vector<1x128xf32>
    %cst_5 = arith.constant 0.000000e+00 : f32
    %53 = vector.broadcast %cst_5 : f32 to vector<1x128xf32>
    %54 = arith.maximumf %52, %53 : vector<1x128xf32>
    %55 = arith.subf %51, %47 : vector<1x128xf32>
    %cst_6 = arith.constant 0.000000e+00 : f32
    %56 = vector.broadcast %cst_6 : f32 to vector<1x128xf32>
    %57 = arith.maximumf %55, %56 : vector<1x128xf32>
    %58 = arith.mulf %54, %57 : vector<1x128xf32>
    %59 = arith.subf %35, %33 : vector<1x128xf32>
    %60 = arith.subf %39, %37 : vector<1x128xf32>
    %61 = arith.mulf %59, %60 : vector<1x128xf32>
    %62 = arith.subf %42, %40 : f32
    %63 = arith.subf %43, %41 : f32
    %64 = arith.mulf %62, %63 : f32
    %65 = vector.broadcast %64 : f32 to vector<1x128xf32>
    %66 = arith.addf %61, %65 : vector<1x128xf32>
    %67 = arith.subf %66, %58 : vector<1x128xf32>
    %cst_7 = arith.constant 1.1920929E-7 : f32
    %68 = vector.broadcast %cst_7 : f32 to vector<1x128xf32>
    %69 = arith.maximumf %67, %68 : vector<1x128xf32>
    %70 = arith.divf %58, %69 : vector<1x128xf32>
    %71 = arith.mulf %70, %7 : vector<1x128xf32>
    %72 = tpu.iota {dimensions = array<i32: 1>} : vector<1x128xi32>
    %c0_8 = arith.constant 0 : index
    %73 = memref.load %arg1[%c0_8] : memref<1xi32, #tpu.memory_space<smem>>
    %74 = vector.broadcast %73 : i32 to vector<1x128xi32>
    %75 = arith.cmpi slt, %72, %74 : vector<1x128xi32>
    %cst_9 = arith.constant 0xFF800000 : f32
    %76 = vector.broadcast %cst_9 : f32 to vector<1x128xf32>
    %77 = arith.select %75, %71, %76 : vector<1x128xi1>, vector<1x128xf32>
    %78 = vector.shape_cast %77 : vector<1x128xf32> to vector<1x1x128xf32>
    %cst_10 = arith.constant dense<0xFF800000> : vector<1xf32>
    %79 = vector.multi_reduction <maximumf>, %78, %cst_10 [1, 2] : vector<1x1x128xf32> to vector<1xf32>
    %80 = vector.shape_cast %79 : vector<1xf32> to vector<1x1x1xf32>
    %81 = vector.extract %80[0, 0, 0] : f32 from vector<1x1x1xf32>
    %82 = vector.broadcast %81 : f32 to vector<1x128xf32>
    %83 = arith.cmpf oge, %77, %82 : vector<1x128xf32>
    %c128_i32 = arith.constant 128 : i32
    %84 = vector.broadcast %c128_i32 : i32 to vector<1x128xi32>
    %85 = arith.select %83, %72, %84 : vector<1x128xi1>, vector<1x128xi32>
    %86 = vector.shape_cast %85 : vector<1x128xi32> to vector<1x1x128xi32>
    %cst_11 = arith.constant dense<2147483647> : vector<1xi32>
    %87 = vector.multi_reduction <minsi>, %86, %cst_11 [1, 2] : vector<1x1x128xi32> to vector<1xi32>
    %88 = vector.shape_cast %87 : vector<1xi32> to vector<1x1x1xi32>
    %89 = vector.extract %88[0, 0, 0] : i32 from vector<1x1x1xi32>
    %c0_12 = arith.constant 0 : index
    %90 = memref.load %arg3[%c0_12] : memref<1xi32, #tpu.memory_space<smem>>
    memref.store %89, %arg3[%c0_12] : memref<1xi32, #tpu.memory_space<smem>>
    return
  }
}

module attributes {stable_mosaic.version = 11 : i64} {
  func.func @_cam_resize_combine_kernel(%arg0: memref<8x128xf32, #tpu.memory_space<vmem>>, %arg1: memref<64x128xf32, #tpu.memory_space<vmem>>, %arg2: memref<128x1024xbf16, #tpu.memory_space<vmem>>, %arg3: memref<1x1024xf32, #tpu.memory_space<vmem>>) attributes {dimension_semantics = [], scalar_prefetch = 0 : i64, scratch_operands = 0 : i64, tpu.core_type = #tpu.core_type<tc>} {
    %c0 = arith.constant 0 : index
    %c0_0 = arith.constant 0 : index
    %0 = vector.load %arg0[%c0, %c0_0] : memref<8x128xf32, #tpu.memory_space<vmem>>, vector<8x128xf32>
    %c0_1 = arith.constant 0 : index
    %c0_2 = arith.constant 0 : index
    %1 = vector.load %arg1[%c0_1, %c0_2] : memref<64x128xf32, #tpu.memory_space<vmem>>, vector<64x128xf32>
    %2 = vector.shape_cast %1 : vector<64x128xf32> to vector<8x8x128xf32>
    %3 = vector.shape_cast %0 : vector<8x128xf32> to vector<1x8x128xf32>
    %4 = vector.broadcast %3 : vector<1x8x128xf32> to vector<8x8x128xf32>
    %5 = arith.mulf %2, %4 : vector<8x8x128xf32>
    %cst = arith.constant dense<0.000000e+00> : vector<8x128xf32>
    %6 = vector.multi_reduction <add>, %5, %cst [1] : vector<8x8x128xf32> to vector<8x128xf32>
    %cst_3 = arith.constant 0.000000e+00 : f32
    %7 = vector.broadcast %cst_3 : f32 to vector<8x128xf32>
    %8 = arith.maximumf %6, %7 : vector<8x128xf32>
    %9 = tpu.iota {dimensions = array<i32: 1>} : vector<8x128xi32>
    %c64_i32 = arith.constant 64 : i32
    %10 = vector.broadcast %c64_i32 : i32 to vector<8x128xi32>
    %11 = arith.cmpi slt, %9, %10 : vector<8x128xi32>
    %c64_i32_4 = arith.constant 64 : i32
    %12 = vector.broadcast %c64_i32_4 : i32 to vector<8x128xi32>
    %13 = arith.cmpi sge, %9, %12 : vector<8x128xi32>
    %c80_i32 = arith.constant 80 : i32
    %14 = vector.broadcast %c80_i32 : i32 to vector<8x128xi32>
    %15 = arith.cmpi slt, %9, %14 : vector<8x128xi32>
    %16 = arith.andi %13, %15 : vector<8x128xi1>
    %cst_5 = arith.constant 0x7F800000 : f32
    %17 = vector.broadcast %cst_5 : f32 to vector<8x128xf32>
    %18 = arith.select %11, %8, %17 : vector<8x128xi1>, vector<8x128xf32>
    %cst_6 = arith.constant dense<0x7F800000> : vector<8xf32>
    %19 = vector.multi_reduction <minimumf>, %18, %cst_6 [1] : vector<8x128xf32> to vector<8xf32>
    %20 = vector.shape_cast %19 : vector<8xf32> to vector<8x1xf32>
    %cst_7 = arith.constant 0xFF800000 : f32
    %21 = vector.broadcast %cst_7 : f32 to vector<8x128xf32>
    %22 = arith.select %11, %8, %21 : vector<8x128xi1>, vector<8x128xf32>
    %cst_8 = arith.constant dense<0xFF800000> : vector<8xf32>
    %23 = vector.multi_reduction <maximumf>, %22, %cst_8 [1] : vector<8x128xf32> to vector<8xf32>
    %24 = vector.shape_cast %23 : vector<8xf32> to vector<8x1xf32>
    %25 = vector.broadcast %20 : vector<8x1xf32> to vector<8x128xf32>
    %26 = arith.subf %8, %25 : vector<8x128xf32>
    %27 = arith.subf %24, %20 : vector<8x1xf32>
    %cst_9 = arith.constant 1.1920929E-7 : f32
    %28 = vector.broadcast %cst_9 : f32 to vector<8x1xf32>
    %29 = arith.maximumf %27, %28 : vector<8x1xf32>
    %30 = vector.broadcast %29 : vector<8x1xf32> to vector<8x128xf32>
    %31 = arith.divf %26, %30 : vector<8x128xf32>
    %cst_10 = arith.constant 0x7F800000 : f32
    %32 = vector.broadcast %cst_10 : f32 to vector<8x128xf32>
    %33 = arith.select %16, %8, %32 : vector<8x128xi1>, vector<8x128xf32>
    %cst_11 = arith.constant dense<0x7F800000> : vector<8xf32>
    %34 = vector.multi_reduction <minimumf>, %33, %cst_11 [1] : vector<8x128xf32> to vector<8xf32>
    %35 = vector.shape_cast %34 : vector<8xf32> to vector<8x1xf32>
    %cst_12 = arith.constant 0xFF800000 : f32
    %36 = vector.broadcast %cst_12 : f32 to vector<8x128xf32>
    %37 = arith.select %16, %8, %36 : vector<8x128xi1>, vector<8x128xf32>
    %cst_13 = arith.constant dense<0xFF800000> : vector<8xf32>
    %38 = vector.multi_reduction <maximumf>, %37, %cst_13 [1] : vector<8x128xf32> to vector<8xf32>
    %39 = vector.shape_cast %38 : vector<8xf32> to vector<8x1xf32>
    %40 = vector.broadcast %35 : vector<8x1xf32> to vector<8x128xf32>
    %41 = arith.subf %8, %40 : vector<8x128xf32>
    %42 = arith.subf %39, %35 : vector<8x1xf32>
    %cst_14 = arith.constant 1.1920929E-7 : f32
    %43 = vector.broadcast %cst_14 : f32 to vector<8x1xf32>
    %44 = arith.maximumf %42, %43 : vector<8x1xf32>
    %45 = vector.broadcast %44 : vector<8x1xf32> to vector<8x128xf32>
    %46 = arith.divf %41, %45 : vector<8x128xf32>
    %cst_15 = arith.constant 0.000000e+00 : f32
    %47 = vector.broadcast %cst_15 : f32 to vector<8x128xf32>
    %48 = arith.select %16, %46, %47 : vector<8x128xi1>, vector<8x128xf32>
    %49 = arith.select %11, %31, %48 : vector<8x128xi1>, vector<8x128xf32>
    %50 = arith.truncf %49 : vector<8x128xf32> to vector<8x128xbf16>
    %c0_16 = arith.constant 0 : index
    %c0_17 = arith.constant 0 : index
    %51 = vector.load %arg2[%c0_16, %c0_17] : memref<128x1024xbf16, #tpu.memory_space<vmem>>, vector<128x1024xbf16>
    %cst_18 = arith.constant dense<0.000000e+00> : vector<8x1024xf32>
    %52 = tpu.matmul %50, %51, %cst_18 {dimension_numbers = #tpu.dot_dimension_numbers<[1], [0], [0], [1], [0, 0, 1, 1], [], []>} : vector<8x128xbf16>, vector<128x1024xbf16>, vector<8x1024xf32> -> vector<8x1024xf32>
    %cst_19 = arith.constant dense<0x7F800000> : vector<8xf32>
    %53 = vector.multi_reduction <minimumf>, %52, %cst_19 [1] : vector<8x1024xf32> to vector<8xf32>
    %54 = vector.shape_cast %53 : vector<8xf32> to vector<8x1xf32>
    %cst_20 = arith.constant dense<0xFF800000> : vector<8xf32>
    %55 = vector.multi_reduction <maximumf>, %52, %cst_20 [1] : vector<8x1024xf32> to vector<8xf32>
    %56 = vector.shape_cast %55 : vector<8xf32> to vector<8x1xf32>
    %57 = vector.broadcast %54 : vector<8x1xf32> to vector<8x1024xf32>
    %58 = arith.subf %52, %57 : vector<8x1024xf32>
    %59 = arith.subf %56, %54 : vector<8x1xf32>
    %cst_21 = arith.constant 1.1920929E-7 : f32
    %60 = vector.broadcast %cst_21 : f32 to vector<8x1xf32>
    %61 = arith.maximumf %59, %60 : vector<8x1xf32>
    %62 = vector.broadcast %61 : vector<8x1xf32> to vector<8x1024xf32>
    %63 = arith.divf %58, %62 : vector<8x1024xf32>
    %cst_22 = arith.constant dense<0xFF800000> : vector<1024xf32>
    %64 = vector.multi_reduction <maximumf>, %63, %cst_22 [0] : vector<8x1024xf32> to vector<1024xf32>
    %65 = vector.shape_cast %64 : vector<1024xf32> to vector<1x1024xf32>
    %c0_23 = arith.constant 0 : index
    %c0_24 = arith.constant 0 : index
    %66 = vector.load %arg3[%c0_23, %c0_24] : memref<1x1024xf32, #tpu.memory_space<vmem>>, vector<1x1024xf32>
    tpu.vector_store %arg3[%c0_23, %c0_24], %65 {strides = array<i32>} : memref<1x1024xf32, #tpu.memory_space<vmem>>, vector<1x1024xf32>,
    return
  }
}

</mosaic_0001>

<bundles_post_ra>
// kernel: fcos_odam_forward.2
= control target key start
LH: loop header
LB: loop body
LE: loop exit
PB: predicated region body
PF: predicated region fallthrough
CT: control target
= control target key end

     0   :  { %9 = vsyncpa [#allocation5], 0  ;;  %s252_s0 = inlined_call_operand.vmem [shape: f32[8], index: 0, kind: input, shape index: {}]   ;;  %s253_s1 = inlined_call_operand.<no memory space> [shape: s32[1], index: 1, kind: input, shape index: {}]   ;;  %s254_s2 = inlined_call_operand.vmem [shape: f32[8,128], index: 2, kind: input, shape index: {}]   ;;  %s255_s3 = inlined_call_operand.hbm [shape: s32[1], index: 3, kind: output, shape index: {}]  }
   0x1   :  { %10 = vsyncpa [#allocation4], 0  ;;  %s17_s14 = sshll.u32 %s252_s0, 4  ;;  %s18_s14 = int_to_ptr.vmem [resolvable:$true] %s17_s14 }
   0x2   :  { %s169_s15 = scalar_lea.vmem %s18_s14, 16  ;;  %p174_p1 = scmp.lt.s32.totalorder %s18_s14, %s18_s14 }
   0x3   :  { %p170_p0 = scmp.ne.s32.totalorder %s18_s14, %s169_s15  ;;  %p175_p2 = scmp.lt.s32.totalorder %s169_s15, %s169_s15 }
   0x5   :  { %p176_p3 = por %p175_p2, %p174_p1 }
   0x7   :  { %p177_p4 = pnand %p176_p3, %p170_p0 }
   0x9   :  { %180 = shalt.err (!%p177_p4)
}
   0xa   :  { %s195_s16 = smov [#allocation3]  }
   0xb   :  { %20 = dma.vmem_to_smem %s18_s14, 16, %s195_s16, [#allocation5]  }
   0xc   :  { %191 = dma.done.wait [#allocation5], 16  }
   0xd   :  { %192 = vsyncadd [#allocation5], 4294967280 }
   0xe   :  { %28 = sfence }
   0xf   :  { %v29_v0 = vld [vmem:[%s254_s2] sm:$0xff]  ;;  %s154_s19 = sld [smem:[#allocation3 + $0x6]]  ;;  %s155_s20 = sld [smem:[#allocation3 + $0x7]]  ;;  %v93_v41 = vlaneseq  ;;  %v96_v44 = vstv %s253_s1  ;;  %vm99_vm1 = vcmask 1040384  }
  0x10   :  { %v33_v1 = vrot.slane %v29_v0, 2  ;;  %v41_v2 = vrot.slane %v29_v0, 4  ;;  %s156_s0 = sld [smem:[#allocation3 + $0x4]]  ;;  %s157_s21 = sld [smem:[#allocation3 + $0x5]]  ;;  %v90_v43 = vrot.slane %v29_v0, 6 }
  0x11   :  { %s223_s22 = sld [smem:[#allocation3]]  ;;  %s225_s23 = sld [smem:[#allocation3 + $0x1]]  ;;  %v94_v42 = vand.u32 127, %v93_v41 }
  0x12   :  { %v35_v3 = vsub.f32 %v29_v0, %v33_v1  ;;  %v43_v4 = vadd.f32 %v41_v2, %v29_v0  ;;  %s227_s24 = sld [smem:[#allocation3 + $0x2]]  ;;  %s160_s25 = sld [smem:[#allocation3 + $0x3]] }
  0x13   :  { %vm97_vm0 = vcmp.lt.s32.totalorder %v94_v42, %v96_v44  ;;  %s181_s6 = scalar_lea.hbm %s255_s3, 16 }
  0x14   :  { %v36_v5 = vmax.f32 %v35_v3, 0.0  ;;  %v44_v6 = vmax.f32 %v43_v4, 0.0  ;;  %p182_p5 = scmp.ne.s32.totalorder %s255_s3, %s181_s6  ;;  %p185_p6 = scmp.lt.u32.totalorder %s181_s6, %s255_s3 }
  0x15   :  { %v37_v7 = vstv %s155_s20  ;;  %v39_v8 = vstv %s154_s19 }
  0x16   :  { %v38_v9 = vmin.f32 %v37_v7, %v36_v5  ;;  %v40_v10 = vmin.f32 %v39_v8, %v36_v5  ;;  %v45_v11 = vmin.f32 %v37_v7, %v44_v6  ;;  %v46_v12 = vmin.f32 %v39_v8, %v44_v6  ;;  %p187_p7 = pnand %p185_p6, %p182_p5 }
  0x17   :  { %v49_v13 = vstv %s156_s0  ;;  %v52_v14 = vstv %s157_s21  ;;  %v59_v15 = vstv %s223_s22  ;;  %v61_v16 = vstv %s225_s23 }
  0x18   :  { %v50_v17 = vmul.f32 %v49_v13, %v38_v9  ;;  %v51_v18 = vmul.f32 %v49_v13, %v45_v11  ;;  %v53_v19 = vmul.f32 %v52_v14, %v40_v10  ;;  %v54_v20 = vmul.f32 %v52_v14, %v46_v12  ;;  %s81_s2 = ssub.f32 %s227_s24, %s223_s22 }
  0x19   :  { %v63_v21 = vstv %s227_s24  ;;  %v65_v22 = vstv %s160_s25  ;;  %s82_s26 = ssub.f32 %s160_s25, %s225_s23 }
  0x1a   :  { %v60_v23 = vmax.f32 %v50_v17, %v59_v15  ;;  %v62_v24 = vmax.f32 %v53_v19, %v61_v16  ;;  %v64_v25 = vmin.f32 %v51_v18, %v63_v21  ;;  %v66_v26 = vmin.f32 %v54_v20, %v65_v22 }
  0x1b   :  { %v75_v27 = vsub.f32 %v51_v18, %v50_v17  ;;  %v76_v28 = vsub.f32 %v54_v20, %v53_v19  ;;  %s83_s27 = smul.f32 %s82_s26, %s81_s2 }
  0x1c   :  { %v67_v29 = vsub.f32 %v64_v25, %v60_v23  ;;  %v69_v30 = vsub.f32 %v66_v26, %v62_v24 }
  0x1d   :  { %v78_v31 = vrot.slane %v76_v28, 1  ;;  %v84_v34 = vstv %s83_s27 }
  0x1e   :  { %v68_v32 = vmax.f32 %v67_v29, 0.0  ;;  %v70_v33 = vmax.f32 %v69_v30, 0.0 }
  0x1f   :  { %v80_v35 = vmul.f32 %v78_v31, %v75_v27 }
  0x20   :  { %v72_v36 = vrot.slane %v70_v33, 1 }
  0x21   :  { %v85_v37 = vadd.f32 %v84_v34, %v80_v35 }
  0x22   :  { %v74_v38 = vmul.f32 %v72_v36, %v68_v32 }
  0x24   :  { %v86_v39 = vsub.f32 %v85_v37, %v74_v38 }
  0x26   :  { %v87_v40 = vmax.f32 %v86_v39, 1.1920929e-07 }
  0x28   :  { %167 = vrcp.f32 %v87_v40 }
  0x32   :  { %v168_v45 = vpop.eup %167 }
  0x33   :  { %v89_v46 = vmul.f32 %v168_v45, %v74_v38 }
  0x35   :  { %v92_v47 = vmul.f32 %v90_v43, %v89_v46 }
  0x37   :  { %v98_v48 = vsel %vm97_vm0, %v92_v47, -inf }
  0x38   :  { %v100_v49 = vsel %vm99_vm1, %v98_v48, -inf }
  0x39   :  { %101 = vmax.xlane.f32.xlu0 %v100_v49 }
  0xc6   :  { %v102_v50 = vpop.xlane.xlu0 %101 }
  0xc7   :  { %v103_v51 = vrot.slane %v102_v50, 4 }
  0xc9   :  { %v104_v52 = vmax.f32 %v102_v50, %v103_v51 }
  0xcb   :  { %v105_v53 = vrot.slane %v104_v52, 2 }
  0xcd   :  { %v106_v54 = vmax.f32 %v104_v52, %v105_v53 }
  0xcf   :  { %v107_v55 = vrot.slane %v106_v54, 1 }
  0xd1   :  { %v108_v56 = vmax.f32 %v106_v54, %v107_v55 }
  0xd3   :  { %161 = vpush %v108_v56 }
 0x104   :  { %s162_s30 = spop %161 }
 0x105   :  { %v110_v57 = vstv %s162_s30 }
 0x106   :  { %vm111_vm2 = vcmp.ge.f32.partialorder %v98_v48, %v110_v57 }
 0x107   :  { %v112_v58 = vsel %vm111_vm2, %v94_v42, 128 }
 0x108   :  { %v113_v59 = vsel %vm99_vm1, %v112_v58, 2147483647 }
 0x109   :  { %v115_v60 = vshra.s32 %v113_v59, 16  ;;  %v114_v62 = vand.u32 65535, %v113_v59 }
 0x10b   :  { %v117_v61 = vcvt.s32.f32 %v115_v60  ;;  %v116_v0 = vcvt.s32.f32 %v114_v62 }
 0x10d   :  { %118 = vmin.xlane.f32.xlu0 %v117_v61 }
 0x19a   :  { %v119_v63 = vpop.xlane.xlu0 %118 }
 0x19b   :  { %vm120_vm3 = vcmp.eq.f32.partialorder %v117_v61, %v119_v63  ;;  %v125_v2 = vcvt.f32.s32 %v119_v63 }
 0x19c   :  { %v121_v1 = vsel %vm120_vm3, %v116_v0, inf }
 0x19d   :  { %122 = vmin.xlane.f32.xlu1 %v121_v1  ;;  %v126_v4 = vshll.u32 %v125_v2, 16 }
 0x22a   :  { %v123_v3 = vpop.xlane.xlu1 %122 }
 0x22b   :  { %v124_v5 = vcvt.f32.s32 %v123_v3 }
 0x22d   :  { %v127_v6 = vadd.s32 %v126_v4, %v124_v5 }
 0x22f   :  { %v128_v7 = vrot.slane %v127_v6, 4 }
 0x231   :  { %vm129_vm4 = vcmp.lt.s32.totalorder %v127_v6, %v128_v7 }
 0x232   :  { %v130_v8 = vsel %vm129_vm4, %v127_v6, %v128_v7 }
 0x233   :  { %v131_v9 = vrot.slane %v130_v8, 2 }
 0x235   :  { %vm132_vm5 = vcmp.lt.s32.totalorder %v130_v8, %v131_v9 }
 0x236   :  { %v133_v10 = vsel %vm132_vm5, %v130_v8, %v131_v9 }
 0x237   :  { %v134_v11 = vrot.slane %v133_v10, 1 }
 0x239   :  { %vm135_vm6 = vcmp.lt.s32.totalorder %v133_v10, %v134_v11 }
 0x23a   :  { %v136_v12 = vsel %vm135_vm6, %v133_v10, %v134_v11 }
 0x23b   :  { %163 = vpush %v136_v12 }
 0x26c   :  { %s164_s1 = spop %163 }
 0x26d   :  { %139 = sst [smem:[#allocation6]] %s164_s1 }
 0x26e   :  { %190 = shalt.err (!%p187_p7)
}
 0x26f   :  { %s196_s11 = smov [#allocation6]  }
 0x270   :  { %147 = dma.smem_to_hbm %s196_s11, 16, %s255_s3, [#allocation4]  }
 0x271   :  { %193 = dma.done.wait [#allocation4], 16  }
 0x272   :  { %194 = vsyncadd [#allocation4], 4294967280 }
 0x273   :  { %151 = sfence }
 0x274   :  { %152 = vsyncpa [#allocation4], 1 }
 0x275   :  { %153 = vsyncpa [#allocation5], 1 }

// kernel: fcos_odam_forward.3
= control target key start
LH: loop header
LB: loop body
LE: loop exit
PB: predicated region body
PF: predicated region fallthrough
CT: control target
= control target key end

     0   :  { %v88_v14 = vlaneseq  ;;  %vm102_vm0 = vcmask 1041409   ;;  %vm104_vm1 = vcmask 1042434   ;;  %vm106_vm2 = vcmask 1043459   ;;  %s1480_s0 = inlined_call_operand.vmem [shape: f32[8,128], index: 0, kind: input, shape index: {}]   ;;  %s1481_s1 = inlined_call_operand.vmem [shape: f32[64,128], index: 1, kind: input, shape index: {}]   ;;  %s1482_s2 = inlined_call_operand.vmem [shape: bf16[128,1024], index: 2, kind: input, shape index: {}]   ;;  %s1483_s3 = inlined_call_operand.vmem [shape: f32[1,1024], index: 3, kind: output, shape index: {}]  }
   0x1   :  { %v15_v0 = vld [vmem:[%s1480_s0] sm:$0xff]  ;;  %v17_v2 = vld [vmem:[%s1481_s1 + $0x8] sm:$0xff]  ;;  %v18_v3 = vld [vmem:[%s1481_s1 + $0x10] sm:$0xff]  ;;  %vm108_vm3 = vcmask 1044484   ;;  %vm110_vm4 = vcmask 1045509   ;;  %vm112_vm7 = vcmask 1046534  }
   0x2   :  { %v16_v1 = vld [vmem:[%s1481_s1] sm:$0xff]  ;;  %v19_v4 = vld [vmem:[%s1481_s1 + $0x18] sm:$0xff]  ;;  %v25_v7 = vmul.f32 %v17_v2, %v15_v0  ;;  %v21_v8 = vld [vmem:[%s1481_s1 + $0x28] sm:$0xff]  ;;  %v26_v11 = vmul.f32 %v18_v3, %v15_v0  ;;  %v1142_v2 = vand.u32 127, %v88_v14  ;;  %vm114_vm8 = vcmask 1047559  }
   0x3   :  { %v20_v5 = vld [vmem:[%s1481_s1 + $0x20] sm:$0xff]  ;;  %v24_v6 = vmul.f32 %v16_v1, %v15_v0  ;;  %v22_v9 = vld [vmem:[%s1481_s1 + $0x30] sm:$0xff]  ;;  %v23_v10 = vld [vmem:[%s1481_s1 + $0x38] sm:$0xff]  ;;  %v27_v12 = vmul.f32 %v19_v4, %v15_v0  ;;  %v29_v15 = vmul.f32 %v21_v8, %v15_v0 }
   0x4   :  { %v28_v13 = vmul.f32 %v20_v5, %v15_v0  ;;  %v30_v16 = vmul.f32 %v22_v9, %v15_v0  ;;  %v31_v17 = vmul.f32 %v23_v10, %v15_v0  ;;  %v38_v19 = vrot.slane %v25_v7, 4 }
   0x5   :  { %v32_v18 = vrot.slane %v24_v6, 4  ;;  %v44_v20 = vrot.slane %v26_v11, 4  ;;  %v50_v21 = vrot.slane %v27_v12, 4  ;;  %v62_v24 = vrot.slane %v29_v15, 4 }
   0x6   :  { %v56_v22 = vrot.slane %v28_v13, 4  ;;  %v68_v25 = vrot.slane %v30_v16, 4  ;;  %v74_v26 = vrot.slane %v31_v17, 4  ;;  %v39_v27 = vadd.f32 %v38_v19, %v25_v7 }
   0x7   :  { %v33_v23 = vadd.f32 %v32_v18, %v24_v6  ;;  %v45_v28 = vadd.f32 %v44_v20, %v26_v11  ;;  %v51_v29 = vadd.f32 %v50_v21, %v27_v12  ;;  %v63_v32 = vadd.f32 %v62_v24, %v29_v15  ;;  %v294_v24 = vld [vmem:[%s1482_s2] sm:$0xff] }
   0x8   :  { %v57_v30 = vadd.f32 %v56_v22, %v28_v13  ;;  %v69_v33 = vadd.f32 %v68_v25, %v30_v16  ;;  %v75_v34 = vadd.f32 %v74_v26, %v31_v17  ;;  %v40_v35 = vrot.slane %v39_v27, 2  ;;  %v298_v25 = vld [vmem:[%s1482_s2 + $0x20] sm:$0xff]  ;;  %v295_v26 = vld [vmem:[%s1482_s2 + $0x8] sm:$0xff]  ;;  %v313_v16 = vld [vmem:[%s1482_s2 + $0x98] sm:$0xff] }
   0x9   :  { %v34_v31 = vrot.slane %v33_v23, 2  ;;  %v46_v36 = vrot.slane %v45_v28, 2  ;;  %v52_v37 = vrot.slane %v51_v29, 2  ;;  %v64_v40 = vrot.slane %v63_v32, 2 }
   0xa   :  { %v58_v38 = vrot.slane %v57_v30, 2  ;;  %v70_v41 = vrot.slane %v69_v33, 2  ;;  %v76_v42 = vrot.slane %v75_v34, 2  ;;  %v41_v43 = vadd.f32 %v40_v35, %v39_v27 }
   0xb   :  { %v35_v39 = vadd.f32 %v34_v31, %v33_v23  ;;  %v47_v44 = vadd.f32 %v46_v36, %v45_v28  ;;  %v53_v45 = vadd.f32 %v52_v37, %v51_v29  ;;  %v65_v48 = vadd.f32 %v64_v40, %v63_v32  ;;  %v299_v28 = vld [vmem:[%s1482_s2 + $0x28] sm:$0xff]  ;;  %v302_v32 = vld [vmem:[%s1482_s2 + $0x40] sm:$0xff] }
   0xc   :  { %v59_v46 = vadd.f32 %v58_v38, %v57_v30  ;;  %v71_v49 = vadd.f32 %v70_v41, %v69_v33  ;;  %v77_v50 = vadd.f32 %v76_v42, %v75_v34  ;;  %v42_v51 = vrot.slane %v41_v43, 1  ;;  %v306_v33 = vld [vmem:[%s1482_s2 + $0x60] sm:$0xff]  ;;  %v303_v34 = vld [vmem:[%s1482_s2 + $0x48] sm:$0xff] }
   0xd   :  { %v36_v47 = vrot.slane %v35_v39, 1  ;;  %v48_v52 = vrot.slane %v47_v44, 1  ;;  %v54_v53 = vrot.slane %v53_v45, 1  ;;  %v66_v56 = vrot.slane %v65_v48, 1  ;;  %v307_v36 = vld [vmem:[%s1482_s2 + $0x68] sm:$0xff]  ;;  %v310_v40 = vld [vmem:[%s1482_s2 + $0x80] sm:$0xff] }
   0xe   :  { %v60_v54 = vrot.slane %v59_v46, 1  ;;  %v72_v57 = vrot.slane %v71_v49, 1  ;;  %v78_v58 = vrot.slane %v77_v50, 1  ;;  %v43_v59 = vadd.f32 %v42_v51, %v41_v43  ;;  %v314_v41 = vld [vmem:[%s1482_s2 + $0xa0] sm:$0xff]  ;;  %v311_v42 = vld [vmem:[%s1482_s2 + $0x88] sm:$0xff] }
   0xf   :  { %v37_v55 = vadd.f32 %v36_v47, %v35_v39  ;;  %v49_v60 = vadd.f32 %v48_v52, %v47_v44  ;;  %v55_v61 = vadd.f32 %v54_v53, %v53_v45  ;;  %v67_v63 = vadd.f32 %v66_v56, %v65_v48  ;;  %v315_v44 = vld [vmem:[%s1482_s2 + $0xa8] sm:$0xff]  ;;  %v318_v48 = vld [vmem:[%s1482_s2 + $0xc0] sm:$0xff] }
  0x10   :  { %v61_v62 = vadd.f32 %v60_v54, %v59_v46  ;;  %v73_v0 = vadd.f32 %v72_v57, %v71_v49  ;;  %v79_v3 = vadd.f32 %v78_v58, %v77_v50  ;;  %v1144_v4 = vmax.f32 %v43_v59, 0.0  ;;  %v322_v49 = vld [vmem:[%s1482_s2 + $0xe0] sm:$0xff]  ;;  %v319_v50 = vld [vmem:[%s1482_s2 + $0xc8] sm:$0xff] }
  0x11   :  { %v1139_v1 = vmax.f32 %v37_v55, 0.0  ;;  %v1146_v5 = vmax.f32 %v49_v60, 0.0  ;;  %v1148_v6 = vmax.f32 %v55_v61, 0.0  ;;  %v1152_v8 = vmax.f32 %v67_v63, 0.0  ;;  %v323_v52 = vld [vmem:[%s1482_s2 + $0xe8] sm:$0xff]  ;;  %v326_v53 = vld [vmem:[%s1482_s2 + $0x100] sm:$0xff] }
  0x12   :  { %v1150_v7 = vmax.f32 %v61_v62, 0.0  ;;  %v1157_v10 = vmax.f32 %v73_v0, 0.0  ;;  %vm91_vm5 = vcmp.ge.s32.totalorder %v1142_v2, 64  ;;  %vm92_vm6 = vcmp.lt.s32.totalorder %v1142_v2, 80  ;;  %v330_v54 = vld [vmem:[%s1482_s2 + $0x120] sm:$0xff]  ;;  %v327_v58 = vld [vmem:[%s1482_s2 + $0x108] sm:$0xff] }
  0x13   :  { %v103_v9 = vsel %vm102_vm0, %v1144_v4, %v1139_v1  ;;  %v1163_v12 = vmax.f32 %v79_v3, 0.0  ;;  %vm1169_vm9 = vmand %vm91_vm5, %vm92_vm6  ;;  %vm90_vm10 = vcmp.lt.s32.totalorder %v1142_v2, 64  ;;  %v991_v27 = vcombine.high %v294_v24, %v298_v25  ;;  %v331_v59 = vld [vmem:[%s1482_s2 + $0x128] sm:$0xff]  ;;  %v334_v63 = vld [vmem:[%s1482_s2 + $0x140] sm:$0xff] }
  0x14   :  { %v105_v11 = vsel %vm104_vm1, %v1146_v5, %v103_v9  ;;  %v993_v29 = vcombine.high %v295_v26, %v299_v28  ;;  %v990_v30 = vcombine.low %v294_v24, %v298_v25  ;;  %v992_v31 = vcombine.low %v295_v26, %v299_v28  ;;  %v338_v0 = vld [vmem:[%s1482_s2 + $0x160] sm:$0xff]  ;;  %v335_v3 = vld [vmem:[%s1482_s2 + $0x148] sm:$0xff]  ;;  %v317_v2 = vld [vmem:[%s1482_s2 + $0xb8] sm:$0xff] }
  0x15   :  { %v107_v13 = vsel %vm106_vm2, %v1148_v6, %v105_v11  ;;  %678 = vmatprep.subr.bf16.mxu0 %v991_v27  ;;  %v999_v35 = vcombine.high %v302_v32, %v306_v33  ;;  %v1001_v37 = vcombine.high %v303_v34, %v307_v36  ;;  %v998_v38 = vcombine.low %v302_v32, %v306_v33  ;;  %v339_v9 = vld [vmem:[%s1482_s2 + $0x168] sm:$0xff]  ;;  %v350_v32 = vld [vmem:[%s1482_s2 + $0x1c0] sm:$0xff] }
  0x16   :  { %v109_v15 = vsel %vm108_vm3, %v1150_v7, %v107_v13  ;;  %719 = vmatprep.subr.bf16.mxu1 %v993_v29  ;;  %679 = vmatpush1.bf16.msra.mxu0 %v990_v30  ;;  %v1000_v39 = vcombine.low %v303_v34, %v307_v36  ;;  %v1007_v43 = vcombine.high %v310_v40, %v314_v41  ;;  %v1090_v55 = vmov 0   ;;  %v1265_v13 = vld [vmem:[%s1482_s2 + $0x10] sm:$0xff]  ;;  %v343_v26 = vld [vmem:[%s1482_s2 + $0x188] sm:$0xff]  ;;  %v354_v33 = vld [vmem:[%s1482_s2 + $0x1e0] sm:$0xff] }
  0x17   :  { %v111_v17 = vsel %vm110_vm4, %v1152_v8, %v109_v15  ;;  %720 = vmatpush1.bf16.msra.mxu1 %v992_v31  ;;  %680 = vmatprep.subr.bf16.mxu0 %v999_v35  ;;  %v1009_v45 = vcombine.high %v311_v42, %v315_v44  ;;  %v1006_v46 = vcombine.low %v310_v40, %v314_v41  ;;  %v347_v27 = vld [vmem:[%s1482_s2 + $0x1a8] sm:$0xff] }
  0x18   :  { %v113_v18 = vsel %vm112_vm7, %v1157_v10, %v111_v17  ;;  %721 = vmatprep.subr.bf16.mxu1 %v1001_v37  ;;  %v1008_v47 = vcombine.low %v311_v42, %v315_v44  ;;  %v1015_v51 = vcombine.high %v318_v48, %v322_v49  ;;  %710 = vmatprep.mubr.bf16.mxu0 %v1090_v55  ;;  %v351_v34 = vld [vmem:[%s1482_s2 + $0x1c8] sm:$0xff] }
  0x19   :  { %v115_v19 = vsel %vm114_vm8, %v1163_v12, %v113_v18  ;;  %v1017_v56 = vcombine.high %v319_v50, %v323_v52  ;;  %v1014_v57 = vcombine.low %v318_v48, %v322_v49  ;;  %v1016_v60 = vcombine.low %v319_v50, %v323_v52  ;;  %751 = vmatprep.mubr.bf16.mxu1 %v1090_v55  ;;  %v1270_v18 = vld [vmem:[%s1482_s2 + $0x30] sm:$0xff]  ;;  %v355_v35 = vld [vmem:[%s1482_s2 + $0x1e8] sm:$0xff] }
  0x1a   :  { %v181_v20 = vsel %vm1169_vm9, %v115_v19, inf  ;;  %v117_v21 = vsel %vm90_vm10, %v115_v19, inf  ;;  %v184_v22 = vsel %vm1169_vm9, %v115_v19, -inf  ;;  %v120_v23 = vsel %vm90_vm10, %v115_v19, -inf  ;;  %681 = vmatpush1.bf16.msra.mxu0 %v998_v38  ;;  %v1275_v19 = vld [vmem:[%s1482_s2 + $0x18] sm:$0xff] }
  0x1b   :  { %182 = vmin.xlane.f32.xlu0 %v181_v20  ;;  %118 = vmin.xlane.f32.xlu1 %v117_v21  ;;  %v1023_v61 = vcombine.high %v326_v53, %v330_v54  ;;  %v1025_v62 = vcombine.high %v327_v58, %v331_v59  ;;  %v1022_v11 = vcombine.low %v326_v53, %v330_v54  ;;  %v1280_v20 = vld [vmem:[%s1482_s2 + $0x38] sm:$0xff] }
  0x1c   :  { %722 = vmatpush1.bf16.msra.mxu1 %v1000_v39  ;;  %682 = vmatprep.subr.bf16.mxu0 %v1007_v43  ;;  %v1024_v15 = vcombine.low %v327_v58, %v331_v59  ;;  %v1031_v17 = vcombine.high %v334_v63, %v338_v0  ;;  %v1033_v21 = vcombine.high %v335_v3, %v339_v9 }
  0x1d   :  { %723 = vmatprep.subr.bf16.mxu1 %v1009_v45  ;;  %v994_v24 = vcombine.low %v1265_v13, %v1270_v18  ;;  %v996_v25 = vcombine.low %v1275_v19, %v1280_v20  ;;  %v1030_v28 = vcombine.low %v334_v63, %v338_v0  ;;  %v1032_v29 = vcombine.low %v335_v3, %v339_v9 }
  0x1e   :  { %683 = vmatpush1.bf16.msra.mxu0 %v1006_v46  ;;  %v1041_v31 = vcombine.high %v343_v26, %v347_v27  ;;  %v1040_v37 = vcombine.low %v343_v26, %v347_v27  ;;  %v1047_v38 = vcombine.high %v350_v32, %v354_v33  ;;  %v1049_v39 = vcombine.high %v351_v34, %v355_v35 }
  0x1f   :  { %185 = vmax.xlane.f32.xlu0 %v184_v22  ;;  %121 = vmax.xlane.f32.xlu1 %v120_v23  ;;  %v342_v22 = vld [vmem:[%s1482_s2 + $0x180] sm:$0xff]  ;;  %v1046_v40 = vcombine.low %v350_v32, %v354_v33  ;;  %v1048_v41 = vcombine.low %v351_v34, %v355_v35  ;;  %v995_v42 = vcombine.high %v1265_v13, %v1270_v18  ;;  %v321_v13 = vld [vmem:[%s1482_s2 + $0xd8] sm:$0xff] }
  0x20   :  { %724 = vmatpush1.bf16.msra.mxu1 %v1008_v47  ;;  %684 = vmatprep.subr.bf16.mxu0 %v1015_v51  ;;  %v346_v23 = vld [vmem:[%s1482_s2 + $0x1a0] sm:$0xff]  ;;  %v997_v43 = vcombine.high %v1275_v19, %v1280_v20  ;;  %v325_v18 = vld [vmem:[%s1482_s2 + $0xf8] sm:$0xff]  ;;  %v1012_v20 = vcombine.low %v313_v16, %v317_v2 }
  0x21   :  { %725 = vmatprep.subr.bf16.mxu1 %v1017_v56  ;;  %v1039_v30 = vcombine.high %v342_v22, %v346_v23  ;;  %v1038_v36 = vcombine.low %v342_v22, %v346_v23 }
  0x22   :  { %685 = vmatpush1.bf16.msra.mxu0 %v1014_v57 }
  0x23   :  { %686 = vmatprep.subr.bf16.mxu0 %v1023_v61 }
  0x24   :  { %726 = vmatpush1.bf16.msra.mxu1 %v1016_v60 }
  0x25   :  { %727 = vmatprep.subr.bf16.mxu1 %v1025_v62 }
  0x26   :  { %687 = vmatpush1.bf16.msra.mxu0 %v1022_v11 }
  0x27   :  { %688 = vmatprep.subr.bf16.mxu0 %v1031_v17 }
  0x28   :  { %728 = vmatpush1.bf16.msra.mxu1 %v1024_v15 }
  0x29   :  { %729 = vmatprep.subr.bf16.mxu1 %v1033_v21 }
  0x2a   :  { %689 = vmatpush1.bf16.msra.mxu0 %v1030_v28 }
  0x2b   :  { %690 = vmatprep.subr.bf16.mxu0 %v1039_v30 }
  0x2c   :  { %730 = vmatpush1.bf16.msra.mxu1 %v1032_v29 }
  0x2d   :  { %731 = vmatprep.subr.bf16.mxu1 %v1041_v31 }
  0x2e   :  { %691 = vmatpush1.bf16.msra.mxu0 %v1038_v36 }
  0x2f   :  { %692 = vmatprep.subr.bf16.mxu0 %v1047_v38 }
  0x30   :  { %732 = vmatpush1.bf16.msra.mxu1 %v1040_v37 }
  0x31   :  { %733 = vmatprep.subr.bf16.mxu1 %v1049_v39 }
  0x32   :  { %693 = vmatpush1.bf16.msra.mxu0 %v1046_v40 }
  0x33   :  { %760 = vmatprep.subr.bf16.mxu0 %v995_v42 }
  0x34   :  { %734 = vmatpush1.bf16.msra.mxu1 %v1048_v41 }
  0x35   :  { %801 = vmatprep.subr.bf16.mxu1 %v997_v43 }
  0xa8   :  { %v1314_v44 = vpop.xlane.xlu0 %182  ;;  %v1316_v45 = vpop.xlane.xlu1 %118 }
  0xa9   :  { %v188_v60 = vrot.slane %v1314_v44, 1  ;;  %v189_v62 = vrot.slane %v1314_v44, 2  ;;  %v190_v63 = vrot.slane %v1314_v44, 3  ;;  %v191_v3 = vrot.slane %v1314_v44, 4 }
  0xaa   :  { %v203_v9 = vsub.f32 %v1139_v1, %v1314_v44  ;;  %v124_v15 = vrot.slane %v1316_v45, 1  ;;  %v125_v17 = vrot.slane %v1316_v45, 2  ;;  %v126_v23 = vrot.slane %v1316_v45, 3 }
  0xab   :  { %v204_v22 = vsub.f32 %v1144_v4, %v188_v60  ;;  %v205_v28 = vsub.f32 %v1146_v5, %v189_v62  ;;  %v206_v29 = vsub.f32 %v1148_v6, %v190_v63  ;;  %v127_v32 = vrot.slane %v1316_v45, 4 }
  0xac   :  { %v186_v46 = vpop.xlane.xlu0 %185  ;;  %v122_v47 = vpop.xlane.xlu1 %121  ;;  %v139_v33 = vsub.f32 %v1139_v1, %v1316_v45  ;;  %v140_v36 = vsub.f32 %v1144_v4, %v124_v15  ;;  %v141_v37 = vsub.f32 %v1146_v5, %v125_v17  ;;  %v128_v40 = vrot.slane %v1316_v45, 5 }
  0xad   :  { %v211_v48 = vsub.f32 %v186_v46, %v1314_v44  ;;  %v147_v49 = vsub.f32 %v122_v47, %v1316_v45  ;;  %v129_v41 = vrot.slane %v1316_v45, 6  ;;  %v130_v46 = vrot.slane %v1316_v45, 7 }
  0xae   :  { %v142_v4 = vsub.f32 %v1148_v6, %v126_v23  ;;  %v143_v5 = vsub.f32 %v1150_v7, %v127_v32  ;;  %v144_v45 = vsub.f32 %v1152_v8, %v128_v40  ;;  %v193_v6 = vrot.slane %v1314_v44, 6 }
  0xaf   :  { %v212_v50 = vmax.f32 %v211_v48, 1.1920929e-07  ;;  %v148_v51 = vmax.f32 %v147_v49, 1.1920929e-07  ;;  %v146_v60 = vsub.f32 %v1163_v12, %v130_v46  ;;  %v194_v62 = vrot.slane %v1314_v44, 7 }
  0xb1   :  { %v214_v52 = vrot.slane %v212_v50, 1  ;;  %v215_v53 = vrot.slane %v212_v50, 2  ;;  %v216_v54 = vrot.slane %v212_v50, 3  ;;  %v217_v56 = vrot.slane %v212_v50, 4 }
  0xb2   :  { %1056 = vrcp.f32 %v212_v50  ;;  %v150_v57 = vrot.slane %v148_v51, 1  ;;  %v151_v58 = vrot.slane %v148_v51, 2  ;;  %v152_v59 = vrot.slane %v148_v51, 3 }
  0xb3   :  { %1058 = vrcp.f32 %v214_v52  ;;  %v153_v61 = vrot.slane %v148_v51, 4  ;;  %v154_v0 = vrot.slane %v148_v51, 5  ;;  %v155_v11 = vrot.slane %v148_v51, 6 }
  0xb4   :  { %1060 = vrcp.f32 %v215_v53  ;;  %v156_v21 = vrot.slane %v148_v51, 7  ;;  %v218_v26 = vrot.slane %v212_v50, 5  ;;  %v219_v30 = vrot.slane %v212_v50, 6 }
  0xb5   :  { %1062 = vrcp.f32 %v216_v54  ;;  %v220_v34 = vrot.slane %v212_v50, 7  ;;  %v207_v52 = vsub.f32 %v1150_v7, %v191_v3  ;;  %v210_v40 = vsub.f32 %v1163_v12, %v194_v62 }
  0xb6   :  { %1064 = vrcp.f32 %v217_v56 }
  0xb7   :  { %1066 = vrcp.f32 %v148_v51  ;;  %v192_v51 = vrot.slane %v1314_v44, 5 }
  0xb8   :  { %1068 = vrcp.f32 %v150_v57  ;;  %v145_v57 = vsub.f32 %v1157_v10, %v129_v41 }
  0xb9   :  { %1070 = vrcp.f32 %v151_v58 }
  0xba   :  { %1072 = vrcp.f32 %v152_v59 }
  0xbb   :  { %1074 = vrcp.f32 %v153_v61 }
  0xbc   :  { %v1057_v27 = vpop.eup %1056  ;;  %1076 = vrcp.f32 %v154_v0 }
  0xbd   :  { %v1059_v31 = vpop.eup %1058  ;;  %1078 = vrcp.f32 %v155_v11  ;;  %v230_v1 = vmul.f32 %v1057_v27, %v203_v9 }
  0xbe   :  { %v1061_v35 = vpop.eup %1060  ;;  %1080 = vrcp.f32 %v156_v21  ;;  %v232_v38 = vmul.f32 %v1059_v31, %v204_v22  ;;  %v208_v21 = vsub.f32 %v1152_v8, %v192_v51 }
  0xbf   :  { %v1063_v39 = vpop.eup %1062  ;;  %v234_v42 = vmul.f32 %v1061_v35, %v205_v28  ;;  %1082 = vrcp.f32 %v218_v26  ;;  %v209_v28 = vsub.f32 %v1157_v10, %v193_v6 }
  0xc0   :  { %v1065_v43 = vpop.eup %1064  ;;  %1084 = vrcp.f32 %v219_v30  ;;  %v253_v47 = vrot.slane %v232_v38, 7  ;;  %v236_v53 = vmul.f32 %v1063_v39, %v206_v29 }
  0xc1   :  { %v1067_v48 = vpop.eup %1066  ;;  %1086 = vrcp.f32 %v220_v34  ;;  %v255_v49 = vrot.slane %v234_v42, 6  ;;  %v238_v63 = vmul.f32 %v1065_v43, %v207_v52 }
  0xc2   :  { %v1069_v50 = vpop.eup %1068  ;;  %v254_v54 = vsel %vm102_vm0, %v253_v47, %v230_v1  ;;  %v166_v7 = vmul.f32 %v1067_v48, %v139_v33  ;;  %v257_v22 = vrot.slane %v236_v53, 5 }
  0xc3   :  { %v1071_v56 = vpop.eup %1070  ;;  %v168_v58 = vmul.f32 %v1069_v50, %v140_v36  ;;  %v256_v9 = vsel %vm104_vm1, %v255_v49, %v254_v54  ;;  %v304_v54 = vld [vmem:[%s1482_s2 + $0x50] sm:$0xff] }
  0xc4   :  { %v1073_v59 = vpop.eup %1072  ;;  %v170_v61 = vmul.f32 %v1071_v56, %v141_v37  ;;  %v258_v32 = vsel %vm106_vm2, %v257_v22, %v256_v9  ;;  %v259_v37 = vrot.slane %v238_v63, 4  ;;  %v312_v63 = vld [vmem:[%s1482_s2 + $0x90] sm:$0xff] }
  0xc5   :  { %v1075_v0 = vpop.eup %1074  ;;  %v172_v3 = vmul.f32 %v1073_v59, %v142_v4  ;;  %v277_v11 = vrot.slane %v168_v58, 7  ;;  %v309_v58 = vld [vmem:[%s1482_s2 + $0x78] sm:$0xff]  ;;  %v332_v22 = vld [vmem:[%s1482_s2 + $0x130] sm:$0xff] }
  0xc6   :  { %v1077_v15 = vpop.eup %1076  ;;  %v174_v17 = vmul.f32 %v1075_v0, %v143_v5  ;;  %v279_v23 = vrot.slane %v170_v61, 6  ;;  %v260_v1 = vsel %vm108_vm3, %v259_v37, %v258_v32  ;;  %v316_v0 = vld [vmem:[%s1482_s2 + $0xb0] sm:$0xff]  ;;  %v341_v32 = vld [vmem:[%s1482_s2 + $0x178] sm:$0xff] }
  0xc7   :  { %v1079_v26 = vpop.eup %1078  ;;  %v176_v27 = vmul.f32 %v1077_v15, %v144_v45  ;;  %v278_v29 = vsel %vm102_vm0, %v277_v11, %v166_v7  ;;  %v281_v44 = vrot.slane %v172_v3, 5  ;;  %v308_v45 = vld [vmem:[%s1482_s2 + $0x70] sm:$0xff]  ;;  %v1011_v9 = vcombine.high %v312_v63, %v316_v0 }
  0xc8   :  { %v1081_v30 = vpop.eup %1080  ;;  %v178_v31 = vmul.f32 %v1079_v26, %v145_v57  ;;  %v280_v33 = vsel %vm104_vm1, %v279_v23, %v278_v29  ;;  %v283_v34 = vrot.slane %v174_v17, 4  ;;  %v305_v57 = vld [vmem:[%s1482_s2 + $0x58] sm:$0xff]  ;;  %v1003_v61 = vcombine.high %v304_v54, %v308_v45  ;;  %v320_v15 = vld [vmem:[%s1482_s2 + $0xd0] sm:$0xff] }
  0xc9   :  { %v1083_v35 = vpop.eup %1082  ;;  %v180_v36 = vmul.f32 %v1081_v30, %v146_v60  ;;  %v282_v8 = vsel %vm106_vm2, %v281_v44, %v280_v33  ;;  %v285_v38 = vrot.slane %v176_v27, 3  ;;  %v1005_v62 = vcombine.high %v305_v57, %v309_v58  ;;  %v324_v17 = vld [vmem:[%s1482_s2 + $0xf0] sm:$0xff]  ;;  %v333_v23 = vld [vmem:[%s1482_s2 + $0x138] sm:$0xff] }
  0xca   :  { %v1085_v39 = vpop.eup %1084  ;;  %v240_v10 = vmul.f32 %v1083_v35, %v208_v21  ;;  %v284_v41 = vsel %vm108_vm3, %v283_v34, %v282_v8  ;;  %v287_v42 = vrot.slane %v178_v31, 2  ;;  %v1002_v7 = vcombine.low %v304_v54, %v308_v45  ;;  %v328_v21 = vld [vmem:[%s1482_s2 + $0x110] sm:$0xff]  ;;  %v337_v31 = vld [vmem:[%s1482_s2 + $0x158] sm:$0xff] }
  0xcb   :  { %v1087_v43 = vpop.eup %1086  ;;  %v242_v46 = vmul.f32 %v1085_v39, %v209_v28  ;;  %v286_v47 = vsel %vm110_vm4, %v285_v38, %v284_v41  ;;  %v289_v50 = vrot.slane %v180_v36, 1  ;;  %v1004_v3 = vcombine.low %v305_v57, %v309_v58  ;;  %v336_v44 = vld [vmem:[%s1482_s2 + $0x150] sm:$0xff]  ;;  %v345_v38 = vld [vmem:[%s1482_s2 + $0x198] sm:$0xff] }
  0xcc   :  { %v244_v48 = vmul.f32 %v1087_v43, %v210_v40  ;;  %v261_v4 = vrot.slane %v240_v10, 3  ;;  %v288_v5 = vsel %vm112_vm7, %v287_v42, %v286_v47  ;;  %v1013_v11 = vcombine.high %v313_v16, %v317_v2  ;;  %v340_v30 = vld [vmem:[%s1482_s2 + $0x170] sm:$0xff]  ;;  %v349_v39 = vld [vmem:[%s1482_s2 + $0x1b8] sm:$0xff] }
  0xcd   :  { %v263_v49 = vrot.slane %v242_v46, 2  ;;  %v290_v53 = vsel %vm114_vm8, %v289_v50, %v288_v5  ;;  %v1010_v19 = vcombine.low %v312_v63, %v316_v0  ;;  %v1018_v26 = vcombine.low %v320_v15, %v324_v17  ;;  %v344_v37 = vld [vmem:[%s1482_s2 + $0x190] sm:$0xff]  ;;  %v357_v47 = vld [vmem:[%s1482_s2 + $0x1f8] sm:$0xff] }
  0xce   :  { %v262_v51 = vsel %vm110_vm4, %v261_v4, %v260_v1  ;;  %v265_v52 = vrot.slane %v244_v48, 1  ;;  %v1020_v27 = vcombine.low %v321_v13, %v325_v18  ;;  %v1027_v28 = vcombine.high %v328_v21, %v332_v22  ;;  %v348_v8 = vld [vmem:[%s1482_s2 + $0x1b0] sm:$0xff]  ;;  %v353_v1 = vld [vmem:[%s1482_s2 + $0x1d8] sm:$0xff] }
  0xcf   :  { %v264_v12 = vsel %vm112_vm7, %v263_v49, %v262_v51  ;;  %v1026_v33 = vcombine.low %v328_v21, %v332_v22  ;;  %v1035_v35 = vcombine.high %v336_v44, %v340_v30  ;;  %v1037_v36 = vcombine.high %v337_v31, %v341_v32  ;;  %v352_v43 = vld [vmem:[%s1482_s2 + $0x1d0] sm:$0xff] }
  0xd0   :  { %v266_v56 = vsel %vm114_vm8, %v265_v52, %v264_v12  ;;  %v1034_v40 = vcombine.low %v336_v44, %v340_v30  ;;  %v1036_v10 = vcombine.low %v337_v31, %v341_v32  ;;  %v1043_v41 = vcombine.high %v344_v37, %v348_v8  ;;  %v356_v46 = vld [vmem:[%s1482_s2 + $0x1f0] sm:$0xff] }
  0xd1   :  { %v268_v6 = vsel %vm1169_vm9, %v266_v56, 0.0  ;;  %v1045_v42 = vcombine.high %v345_v38, %v349_v39  ;;  %v1042_v48 = vcombine.low %v344_v37, %v348_v8  ;;  %v1044_v4 = vcombine.low %v345_v38, %v349_v39 }
  0xd2   :  { %v292_v59 = vsel %vm90_vm10, %v290_v53, %v268_v6  ;;  %v1051_v5 = vcombine.high %v352_v43, %v356_v46  ;;  %v1053_v49 = vcombine.high %v353_v1, %v357_v47  ;;  %v1050_v50 = vcombine.low %v352_v43, %v356_v46 }
  0xd3   :  { %v1382_v60 = vpack.c.bf16 %v292_v59, %v292_v59  ;;  %v1052_v51 = vcombine.low %v353_v1, %v357_v47  ;;  %v943_v44 = vshrl.u32 %v88_v14, 7 }
  0xd5   :  { %711 = vmatmul.mubr.bf16.vlgmr.msra.gmra.mrb[0].mxu0 %v1382_v60  ;;  %752 = vmatmul.mubr.bf16.vlgmr.msra.gmra.mrb[0].mxu1 %v1382_v60 }
  0xd6   :  { %761 = vmatpush1.bf16.msra.mxu0 %v994_v24  ;;  %802 = vmatpush1.bf16.msra.mxu1 %v996_v25  ;;  %v1019_v24 = vcombine.high %v320_v15, %v324_v17  ;;  %v1021_v25 = vcombine.high %v321_v13, %v325_v18 }
  0xd7   :  { %762 = vmatprep.subr.bf16.mxu0 %v1003_v61  ;;  %803 = vmatprep.subr.bf16.mxu1 %v1005_v62 }
  0xd8   :  { %792 = vmatprep.mubr.bf16.mxu0 %v1090_v55  ;;  %833 = vmatprep.mubr.bf16.mxu1 %v1090_v55  ;;  %v329_v55 = vld [vmem:[%s1482_s2 + $0x118] sm:$0xff] }
  0xd9   :  { %v1029_v29 = vcombine.high %v329_v55, %v333_v23  ;;  %v1028_v34 = vcombine.low %v329_v55, %v333_v23 }
  0xda   :  { %763 = vmatpush1.bf16.msra.mxu0 %v1002_v7  ;;  %804 = vmatpush1.bf16.msra.mxu1 %v1004_v3 }
  0xdb   :  { %764 = vmatprep.subr.bf16.mxu0 %v1011_v9  ;;  %805 = vmatprep.subr.bf16.mxu1 %v1013_v11 }
  0xde   :  { %765 = vmatpush1.bf16.msra.mxu0 %v1010_v19  ;;  %806 = vmatpush1.bf16.msra.mxu1 %v1012_v20 }
  0xdf   :  { %766 = vmatprep.subr.bf16.mxu0 %v1019_v24  ;;  %807 = vmatprep.subr.bf16.mxu1 %v1021_v25 }
  0xe2   :  { %767 = vmatpush1.bf16.msra.mxu0 %v1018_v26  ;;  %808 = vmatpush1.bf16.msra.mxu1 %v1020_v27  ;;  %v1091_v27 = vmov 1966171168  }
  0xe3   :  { %768 = vmatprep.subr.bf16.mxu0 %v1027_v28  ;;  %809 = vmatprep.subr.bf16.mxu1 %v1029_v29  ;;  %v940_v28 = vunpack.c.l.s4 %v1091_v27 }
  0xe5   :  { %v941_v29 = vunpack.c.0.s8 %v940_v28 }
  0xe6   :  { %769 = vmatpush1.bf16.msra.mxu0 %v1026_v33  ;;  %810 = vmatpush1.bf16.msra.mxu1 %v1028_v34 }
  0xe7   :  { %770 = vmatprep.subr.bf16.mxu0 %v1035_v35  ;;  %811 = vmatprep.subr.bf16.mxu1 %v1037_v36  ;;  %v1469_v30 = vsub.s32 %v941_v29, %v943_v44 }
  0xea   :  { %771 = vmatpush1.bf16.msra.mxu0 %v1034_v40  ;;  %812 = vmatpush1.bf16.msra.mxu1 %v1036_v10 }
  0xeb   :  { %772 = vmatprep.subr.bf16.mxu0 %v1043_v41  ;;  %813 = vmatprep.subr.bf16.mxu1 %v1045_v42 }
  0xee   :  { %773 = vmatpush1.bf16.msra.mxu0 %v1042_v48  ;;  %814 = vmatpush1.bf16.msra.mxu1 %v1044_v4 }
  0xef   :  { %774 = vmatprep.subr.bf16.mxu0 %v1051_v5  ;;  %815 = vmatprep.subr.bf16.mxu1 %v1053_v49 }
  0xf2   :  { %775 = vmatpush1.bf16.msra.mxu0 %v1050_v50  ;;  %816 = vmatpush1.bf16.msra.mxu1 %v1052_v51 }
  0xf5   :  { %793 = vmatmul.mubr.bf16.vlgmr.msra.gmra.mrb[4].mxu0 %v1382_v60  ;;  %834 = vmatmul.mubr.bf16.vlgmr.msra.gmra.mrb[4].mxu1 %v1382_v60 }
 0x1a8   :  { %v712_v52 = vpop.f32.mrb[0].mxu0  ;;  %v753_v12 = vpop.f32.mrb[0].mxu1 }
 0x1a9   :  { %v714_v53 = vpop.f32.mrb[1].mxu0  ;;  %v755_v54 = vpop.f32.mrb[1].mxu1 }
 0x1aa   :  { %v716_v56 = vpop.f32.mrb[2].mxu0  ;;  %v757_v45 = vpop.f32.mrb[2].mxu1 }
 0x1ab   :  { %v717_v57 = vpop.f32.mrb[3].mxu0  ;;  %v758_v58 = vpop.f32.mrb[3].mxu1 }
 0x1c8   :  { %v794_v6 = vpop.f32.mrb[4].mxu0  ;;  %v835_v59 = vpop.f32.mrb[4].mxu1 }
 0x1c9   :  { %v842_v61 = vmin.f32 %v712_v52, %v794_v6  ;;  %v851_v62 = vmax.f32 %v712_v52, %v794_v6  ;;  %v844_v63 = vmin.f32 %v753_v12, %v835_v59  ;;  %v853_v0 = vmax.f32 %v753_v12, %v835_v59  ;;  %v796_v16 = vpop.f32.mrb[5].mxu0  ;;  %v837_v2 = vpop.f32.mrb[5].mxu1 }
 0x1ca   :  { %v843_v7 = vmin.f32 %v714_v53, %v796_v16  ;;  %v852_v3 = vmax.f32 %v714_v53, %v796_v16  ;;  %v845_v9 = vmin.f32 %v755_v54, %v837_v2  ;;  %v854_v60 = vmax.f32 %v755_v54, %v837_v2  ;;  %v798_v11 = vpop.f32.mrb[6].mxu0  ;;  %v839_v15 = vpop.f32.mrb[6].mxu1 }
 0x1cb   :  { %v799_v17 = vpop.f32.mrb[7].mxu0  ;;  %v840_v13 = vpop.f32.mrb[7].mxu1 }
 0x1cc   :  { %v855_v18 = vmax.f32 %v851_v62, %v852_v3  ;;  %v856_v19 = vmax.f32 %v853_v0, %v854_v60  ;;  %v846_v20 = vmin.f32 %v842_v61, %v843_v7  ;;  %v847_v24 = vmin.f32 %v844_v63, %v845_v9 }
 0x1ce   :  { %v857_v25 = vmax.f32 %v855_v18, %v856_v19  ;;  %v848_v21 = vmin.f32 %v846_v20, %v847_v24 }
 0x1d0   :  { %858 = vmax.xlane.f32.xlu1 %v857_v25  ;;  %849 = vmin.xlane.f32.xlu0 %v848_v21 }
 0x25d   :  { %v859_v22 = vpop.xlane.xlu1 %858  ;;  %v850_v55 = vpop.xlane.xlu0 %849 }
 0x25e   :  { %v868_v23 = vsub.f32 %v859_v22, %v850_v55  ;;  %v860_v31 = vsub.f32 %v712_v52, %v850_v55  ;;  %v861_v32 = vsub.f32 %v714_v53, %v850_v55  ;;  %v862_v33 = vsub.f32 %v753_v12, %v850_v55 }
 0x25f   :  { %v863_v34 = vsub.f32 %v755_v54, %v850_v55  ;;  %v864_v36 = vsub.f32 %v794_v6, %v850_v55  ;;  %v865_v37 = vsub.f32 %v796_v16, %v850_v55  ;;  %v866_v8 = vsub.f32 %v835_v59, %v850_v55 }
 0x260   :  { %v869_v26 = vmax.f32 %v868_v23, 1.1920929e-07  ;;  %v867_v38 = vsub.f32 %v837_v2, %v850_v55 }
 0x262   :  { %1088 = vrcp.f32 %v869_v26 }
 0x26c   :  { %v1089_v35 = vpop.eup %1088 }
 0x26d   :  { %v871_v39 = vmul.f32 %v1089_v35, %v860_v31  ;;  %v872_v40 = vmul.f32 %v1089_v35, %v861_v32  ;;  %v873_v10 = vmul.f32 %v1089_v35, %v862_v33  ;;  %v874_v41 = vmul.f32 %v1089_v35, %v863_v34 }
 0x26e   :  { %v875_v42 = vmul.f32 %v1089_v35, %v864_v36  ;;  %v876_v43 = vmul.f32 %v1089_v35, %v865_v37  ;;  %v877_v46 = vmul.f32 %v1089_v35, %v866_v8  ;;  %v878_v1 = vmul.f32 %v1089_v35, %v867_v38 }
 0x26f   :  { %v879_v14 = vrot.slane %v871_v39, 4  ;;  %v885_v47 = vrot.slane %v872_v40, 4  ;;  %v891_v48 = vrot.slane %v873_v10, 4  ;;  %v897_v4 = vrot.slane %v874_v41, 4 }
 0x270   :  { %v903_v5 = vrot.slane %v875_v42, 4  ;;  %v909_v49 = vrot.slane %v876_v43, 4  ;;  %v915_v50 = vrot.slane %v877_v46, 4  ;;  %v921_v51 = vrot.slane %v878_v1, 4 }
 0x271   :  { %v880_v52 = vmax.f32 %v871_v39, %v879_v14  ;;  %v886_v12 = vmax.f32 %v872_v40, %v885_v47  ;;  %v892_v53 = vmax.f32 %v873_v10, %v891_v48  ;;  %v898_v54 = vmax.f32 %v874_v41, %v897_v4 }
 0x272   :  { %v904_v56 = vmax.f32 %v875_v42, %v903_v5  ;;  %v910_v45 = vmax.f32 %v876_v43, %v909_v49  ;;  %v916_v57 = vmax.f32 %v877_v46, %v915_v50  ;;  %v922_v58 = vmax.f32 %v878_v1, %v921_v51 }
 0x273   :  { %v881_v6 = vrot.slane %v880_v52, 2  ;;  %v887_v59 = vrot.slane %v886_v12, 2  ;;  %v893_v61 = vrot.slane %v892_v53, 2  ;;  %v899_v62 = vrot.slane %v898_v54, 2 }
 0x274   :  { %v905_v63 = vrot.slane %v904_v56, 2  ;;  %v911_v0 = vrot.slane %v910_v45, 2  ;;  %v917_v16 = vrot.slane %v916_v57, 2  ;;  %v923_v2 = vrot.slane %v922_v58, 2 }
 0x275   :  { %v882_v7 = vmax.f32 %v880_v52, %v881_v6  ;;  %v888_v3 = vmax.f32 %v886_v12, %v887_v59  ;;  %v894_v9 = vmax.f32 %v892_v53, %v893_v61  ;;  %v900_v60 = vmax.f32 %v898_v54, %v899_v62 }
 0x276   :  { %v906_v11 = vmax.f32 %v904_v56, %v905_v63  ;;  %v912_v15 = vmax.f32 %v910_v45, %v911_v0  ;;  %v918_v17 = vmax.f32 %v916_v57, %v917_v16  ;;  %v924_v13 = vmax.f32 %v922_v58, %v923_v2 }
 0x277   :  { %v883_v18 = vrot.slane %v882_v7, 1  ;;  %v889_v19 = vrot.slane %v888_v3, 1  ;;  %v895_v20 = vrot.slane %v894_v9, 1  ;;  %v901_v24 = vrot.slane %v900_v60, 1 }
 0x278   :  { %v907_v25 = vrot.slane %v906_v11, 1  ;;  %v913_v21 = vrot.slane %v912_v15, 1  ;;  %v919_v22 = vrot.slane %v918_v17, 1  ;;  %v925_v55 = vrot.slane %v924_v13, 1 }
 0x279   :  { %v884_v23 = vmax.f32 %v882_v7, %v883_v18  ;;  %v890_v26 = vmax.f32 %v888_v3, %v889_v19  ;;  %v896_v27 = vmax.f32 %v894_v9, %v895_v20  ;;  %v902_v28 = vmax.f32 %v900_v60, %v901_v24 }
 0x27a   :  { %v908_v29 = vmax.f32 %v906_v11, %v907_v25  ;;  %v914_v44 = vmax.f32 %v912_v15, %v913_v21  ;;  %v920_v31 = vmax.f32 %v918_v17, %v919_v22  ;;  %v926_v32 = vmax.f32 %v924_v13, %v925_v55 }
 0x27b   :  { %v935_v33 = vcombine.low %v884_v23, %v890_v26  ;;  %v936_v34 = vcombine.low %v896_v27, %v902_v28 }
 0x27c   :  { %v937_v35 = vcombine.low %v908_v29, %v914_v44  ;;  %v938_v36 = vcombine.low %v920_v31, %v926_v32 }
 0x27d   :  { %v945_v37 = vrot.slane %v935_v33, %v1469_v30  ;;  %v952_v8 = vrot.slane %v936_v34, %v1469_v30 }
 0x27e   :  { %v959_v38 = vrot.slane %v937_v35, %v1469_v30  ;;  %v966_v39 = vrot.slane %v938_v36, %v1469_v30 }
 0x27f   :  { %v967_v40 = vcombine.low %v945_v37, %v952_v8 }
 0x280   :  { %v968_v10 = vcombine.low %v959_v38, %v966_v39 }
 0x281   :  { %v975_v41 = vrot.slane %v967_v40, %v1469_v30 }
 0x282   :  { %v982_v42 = vrot.slane %v968_v10, %v1469_v30 }
 0x284   :  { %v983_v43 = vcombine.low %v975_v41, %v982_v42 }
 0x286   :  { %985 = vst [vmem:[%s1483_s3] sm:$0xff] %v983_v43 }

</bundles_post_ra>
